<compile_context>
chip_gen: v7x
topology: tpu7x:2x2x1
jax: 0.10.0
libtpu: 0.0.40
codegen_flags: <defaults>
</compile_context>

<pallas_src>
import functools

import jax
import jax.numpy as jnp
from jax.experimental import pallas as pl
from jax.experimental.pallas import tpu as pltpu


def _round_up(x, m):
    return (x + m - 1) // m * m


# ----------------------------------------------------------------------------
# Kernels
# ----------------------------------------------------------------------------
def fc_kernel_single_k(x_ref, w_ref, shift_ref, o_ref):
    # Entire contraction in one MXU pass: no scratch accumulator needed.
    acc = jnp.dot(x_ref[...], w_ref[...], preferred_element_type=jnp.float32)
    y = acc + shift_ref[...]                      # bias + BN affine (folded)
    o_ref[...] = jnp.maximum(y, 0.0).astype(o_ref.dtype)


def fc_kernel_multi_k(x_ref, w_ref, shift_ref, o_ref, acc_ref):
    # x_ref:     (tm, tk)      activation tile (compute dtype)
    # w_ref:     (tk, tn)      folded weight tile (compute dtype)
    # shift_ref: (1, tn)       folded bias + BN shift (f32)
    # o_ref:     (tm, tn)      output tile
    # acc_ref:   (tm, tn) f32  accumulator, persists across the K grid axis
    k = pl.program_id(2)

    @pl.when(k == 0)
    def _init():
        acc_ref[...] = jnp.zeros_like(acc_ref)

    acc_ref[...] += jnp.dot(x_ref[...], w_ref[...],
                            preferred_element_type=jnp.float32)

    @pl.when(k == pl.num_programs(2) - 1)
    def _finalize():
        y = acc_ref[...] + shift_ref[...]          # bias + BN affine (folded)
        o_ref[...] = jnp.maximum(y, 0.0).astype(o_ref.dtype)


# ----------------------------------------------------------------------------
# Wrapper
# ----------------------------------------------------------------------------
@functools.partial(
    jax.jit,
    static_argnames=("use_bn", "eps", "compute_dtype", "out_dtype",
                     "tm_max", "tn_max", "tk_max"))
def fc_forward(x, w, b, gamma, beta, running_mean, running_var, *,
               use_bn=True, eps=1e-5,
               compute_dtype=jnp.bfloat16, out_dtype=jnp.float32,
               tm_max=256, tn_max=512, tk_max=1024):
    """Fused Dropout(eval) -> Linear -> BatchNorm1d(eval) -> ReLU."""
    B, d_in = x.shape
    d_out = w.shape[1]

    # ---- fold bias and BatchNorm1d(eval) into (W * scale, shift_total) ----
    if use_bn:
        scale = gamma / jnp.sqrt(running_var + eps)
        shift = b * scale + (beta - running_mean * scale)
        w_folded = w * scale[None, :]
    else:
        shift = b
        w_folded = w

    # ---- tile sizes: lane-dense N, MXU-aligned, adaptive to problem size ----
    tm = min(tm_max, _round_up(B, 8))          # batch tile (sublane axis)
    tn = min(tn_max, _round_up(d_out, 128))    # feature tile (lane axis, >=128)
    tk = min(tk_max, _round_up(d_in, 128))     # contraction tile

    Bp = _round_up(B, tm)
    Kp = _round_up(d_in, tk)
    Np = _round_up(d_out, tn)

    # ---- zero-pad to tile boundaries (zeros are matmul/ReLU neutral) ----
    # Under jit, zero-width pads are no-ops.
    xp = jnp.pad(x, ((0, Bp - B), (0, Kp - d_in))).astype(compute_dtype)
    wp = jnp.pad(w_folded, ((0, Kp - d_in), (0, Np - d_out))).astype(compute_dtype)
    shiftp = jnp.pad(shift, (0, Np - d_out)).reshape(1, Np).astype(jnp.float32)

    n_k = Kp // tk

    bytes_accessed = (xp.size * xp.dtype.itemsize * (Np // tn)
                      + wp.size * wp.dtype.itemsize * (Bp // tm)
                      + shiftp.size * 4
                      + Bp * Np * jnp.dtype(out_dtype).itemsize)
    cost = pl.CostEstimate(flops=2 * Bp * Kp * Np, transcendentals=0,
                           bytes_accessed=bytes_accessed)

    if n_k == 1:
        # Whole contraction fits one tile: no scratch accumulator / K axis.
        out = pl.pallas_call(
            fc_kernel_single_k,
            out_shape=jax.ShapeDtypeStruct((Bp, Np), out_dtype),
            grid_spec=pltpu.PrefetchScalarGridSpec(
                num_scalar_prefetch=0,
                grid=(Bp // tm, Np // tn),
                in_specs=[
                    pl.BlockSpec((tm, Kp), lambda i, j: (i, 0)),   # x tile
                    pl.BlockSpec((Kp, tn), lambda i, j: (0, j)),   # folded W tile
                    pl.BlockSpec((1, tn), lambda i, j: (0, j)),    # folded shift
                ],
                out_specs=pl.BlockSpec((tm, tn), lambda i, j: (i, j)),
            ),
            compiler_params=pltpu.CompilerParams(
                dimension_semantics=("parallel", "parallel")),
            cost_estimate=cost,
        )(xp, wp, shiftp)
    else:
        out = pl.pallas_call(
            fc_kernel_multi_k,
            out_shape=jax.ShapeDtypeStruct((Bp, Np), out_dtype),
            grid_spec=pltpu.PrefetchScalarGridSpec(
                num_scalar_prefetch=0,
                grid=(Bp // tm, Np // tn, n_k),
                in_specs=[
                    pl.BlockSpec((tm, tk), lambda i, j, k: (i, k)),   # x tile
                    pl.BlockSpec((tk, tn), lambda i, j, k: (k, j)),   # folded W tile
                    pl.BlockSpec((1, tn), lambda i, j, k: (0, j)),    # folded shift
                ],
                out_specs=pl.BlockSpec((tm, tn), lambda i, j, k: (i, j)),
                scratch_shapes=[pltpu.VMEM((tm, tn), jnp.float32)],
            ),
            compiler_params=pltpu.CompilerParams(
                dimension_semantics=("parallel", "parallel", "arbitrary")),
            cost_estimate=cost,
        )(xp, wp, shiftp)

    # Strip padding back to the logical shape.
    return out[:B, :d_out]


def fc_reference(x, w, b, gamma, beta, running_mean, running_var,
                 *, use_bn=True, eps=1e-5):
    y = x @ w + b
    if use_bn:
        y = (y - running_mean) / jnp.sqrt(running_var + eps) * gamma + beta
    return jnp.maximum(y, 0.0)


if __name__ == "__main__":
    key = jax.random.PRNGKey(0)
    kx, kw, kb, kx2, kx3, kw3, kb3 = jax.random.split(key, 7)

    # Small shapes consistent with the module: [B, input_dim] -> [B, output_dim]
    B, input_dim, output_dim = 8, 32, 64

    x = jax.random.normal(kx, (B, input_dim), dtype=jnp.float32)
    bound = 1.0 / (input_dim ** 0.5)
    w = jax.random.uniform(kw, (input_dim, output_dim), jnp.float32, -bound, bound)
    b = jax.random.uniform(kb, (output_dim,), jnp.float32, -bound, bound)

    gamma = jnp.linspace(0.5, 1.5, output_dim, dtype=jnp.float32)
    beta = jnp.linspace(-0.1, 0.1, output_dim, dtype=jnp.float32)
    running_mean = jnp.linspace(-0.2, 0.2, output_dim, dtype=jnp.float32)
    running_var = jnp.linspace(0.8, 1.2, output_dim, dtype=jnp.float32)

    ref = fc_reference(x, w, b, gamma, beta, running_mean, running_var, use_bn=True)

    # f32 operand path: tight tolerance vs reference.
    out_f32 = fc_forward(x, w, b, gamma, beta, running_mean, running_var,
                         use_bn=True, compute_dtype=jnp.float32)
    out_f32 = jax.block_until_ready(out_f32)
    assert out_f32.shape == (B, output_dim)
    assert jnp.allclose(out_f32, ref, atol=1e-4, rtol=1e-4), "f32 mismatch vs reference"

    # bf16 operand path (v6e/v7x MXU fast path), f32 accumulation: looser tolerance.
    out_bf16 = fc_forward(x, w, b, gamma, beta, running_mean, running_var,
                          use_bn=True, compute_dtype=jnp.bfloat16)
    out_bf16 = jax.block_until_ready(out_bf16)
    assert out_bf16.shape == (B, output_dim)
    assert jnp.allclose(out_bf16, ref, atol=5e-2, rtol=5e-2), "bf16 mismatch vs reference"

    # Ragged shapes exercise the pad-to-tile tail handling (no rows dropped).
    B2, d_in2, d_out2 = 13, 50, 70
    x2 = jax.random.normal(kx2, (B2, d_in2), dtype=jnp.float32)
    bound2 = 1.0 / (d_in2 ** 0.5)
    w2 = jax.random.uniform(kw, (d_in2, d_out2), jnp.float32, -bound2, bound2)
    b2 = jax.random.uniform(kb, (d_out2,), jnp.float32, -bound2, bound2)
    out2 = fc_forward(x2, w2, b2, None, None, None, None,
                      use_bn=False, compute_dtype=jnp.float32)
    out2 = jax.block_until_ready(out2)
    ref2 = fc_reference(x2, w2, b2, None, None, None, None, use_bn=False)
    assert out2.shape == (B2, d_out2)
    assert jnp.allclose(out2, ref2, atol=1e-4, rtol=1e-4), "ragged mismatch vs reference"

    # Larger contraction than one tile: exercises the multi-K accumulator path.
    B3, d_in3, d_out3 = 32, 1536, 256
    x3 = jax.random.normal(kx3, (B3, d_in3), dtype=jnp.float32)
    bound3 = 1.0 / (d_in3 ** 0.5)
    w3 = jax.random.uniform(kw3, (d_in3, d_out3), jnp.float32, -bound3, bound3)
    b3 = jax.random.uniform(kb3, (d_out3,), jnp.float32, -bound3, bound3)
    out3 = fc_forward(x3, w3, b3, None, None, None, None,
                      use_bn=False, compute_dtype=jnp.float32)
    out3 = jax.block_until_ready(out3)
    ref3 = fc_reference(x3, w3, b3, None, None, None, None, use_bn=False)
    assert out3.shape == (B3, d_out3)
    assert jnp.allclose(out3, ref3, atol=1e-3, rtol=1e-3), "multi-K mismatch vs reference"

    print("KERNEL_OK")
</pallas_src>

<mosaic_0001>
module attributes {stable_mosaic.version = 11 : i64} {
  func.func @fc_kernel_single_k(%arg0: i32, %arg1: i32, %arg2: memref<8x128xf32, #tpu.memory_space<vmem>>, %arg3: memref<128x128xf32, #tpu.memory_space<vmem>>, %arg4: memref<1x128xf32, #tpu.memory_space<vmem>>, %arg5: memref<8x128xf32, #tpu.memory_space<vmem>>) attributes {dimension_semantics = [#tpu.dimension_semantics<parallel>, #tpu.dimension_semantics<parallel>], iteration_bounds = array<i64: 1, 1>, scalar_prefetch = 0 : i64, scratch_operands = 0 : i64, tpu.core_type = #tpu.core_type<tc>, window_params = [{transform_indices = @transform_0, window_bounds = array<i64: 8, 128>}, {transform_indices = @transform_1, window_bounds = array<i64: 128, 128>}, {transform_indices = @transform_2, window_bounds = array<i64: 1, 128>}, {transform_indices = @transform_3, window_bounds = array<i64: 8, 128>}]} {
    %c0 = arith.constant 0 : index
    %c0_0 = arith.constant 0 : index
    %0 = vector.load %arg2[%c0, %c0_0] : memref<8x128xf32, #tpu.memory_space<vmem>>, vector<8x128xf32>
    %c0_1 = arith.constant 0 : index
    %c0_2 = arith.constant 0 : index
    %1 = vector.load %arg3[%c0_1, %c0_2] : memref<128x128xf32, #tpu.memory_space<vmem>>, vector<128x128xf32>
    %cst = arith.constant dense<0.000000e+00> : vector<8x128xf32>
    %2 = tpu.matmul %0, %1, %cst {dimension_numbers = #tpu.dot_dimension_numbers<[1], [0], [0], [1], [0, 0, 1, 1], [], []>} : vector<8x128xf32>, vector<128x128xf32>, vector<8x128xf32> -> vector<8x128xf32>
    %c0_3 = arith.constant 0 : index
    %c0_4 = arith.constant 0 : index
    %3 = vector.load %arg4[%c0_3, %c0_4] : memref<1x128xf32, #tpu.memory_space<vmem>>, vector<1x128xf32>
    %4 = vector.broadcast %3 : vector<1x128xf32> to vector<8x128xf32>
    %5 = arith.addf %2, %4 : vector<8x128xf32>
    %cst_5 = arith.constant 0.000000e+00 : f32
    %6 = vector.broadcast %cst_5 : f32 to vector<8x128xf32>
    %7 = arith.maximumf %5, %6 : vector<8x128xf32>
    %c0_6 = arith.constant 0 : index
    %c0_7 = arith.constant 0 : index
    %8 = vector.load %arg5[%c0_6, %c0_7] : memref<8x128xf32, #tpu.memory_space<vmem>>, vector<8x128xf32>
    tpu.vector_store %arg5[%c0_6, %c0_7], %7 {strides = array<i32>} : memref<8x128xf32, #tpu.memory_space<vmem>>, vector<8x128xf32>,
    return
  }
  func.func @transform_0(%arg0: i32, %arg1: i32) -> (i32, i32) {
    %c0_i32 = arith.constant 0 : i32
    %c0_i32_0 = arith.constant 0 : i32
    return %arg0, %c0_i32 : i32, i32
  }
  func.func @transform_1(%arg0: i32, %arg1: i32) -> (i32, i32) {
    %c0_i32 = arith.constant 0 : i32
    %c0_i32_0 = arith.constant 0 : i32
    return %c0_i32, %arg1 : i32, i32
  }
  func.func @transform_2(%arg0: i32, %arg1: i32) -> (i32, i32) {
    %c0_i32 = arith.constant 0 : i32
    %c0_i32_0 = arith.constant 0 : i32
    return %c0_i32, %arg1 : i32, i32
  }
  func.func @transform_3(%arg0: i32, %arg1: i32) -> (i32, i32) {
    %c0_i32 = arith.constant 0 : i32
    return %arg0, %arg1 : i32, i32
  }
}

</mosaic_0001>

<bundles_post_ra>
// kernel: fc_forward.1
= control target key start
LH: loop header
LB: loop body
LE: loop exit
PB: predicated region body
PF: predicated region fallthrough
CT: control target
= control target key end

     0   :  { %v230_v3 = vmov 0.0|0.0   ;;  %vm231_vm0 = vmmov 0   ;;  %v232_v6 = vmov 0.0   ;;  %s320_s0 = inlined_call_operand.vmem [shape: f32[8,128], index: 0, kind: input, shape index: {}]   ;;  %s321_s1 = inlined_call_operand.vmem [shape: f32[128,128], index: 1, kind: input, shape index: {}]   ;;  %s322_s2 = inlined_call_operand.vmem [shape: f32[1,128], index: 2, kind: input, shape index: {}]   ;;  %s323_s3 = inlined_call_operand.hbm [shape: f32[8,128], index: 3, kind: output, shape index: {}]  }
   0x1   :  { %v16_v0 = vld [vmem:[%s321_s1] sm:$0xff]  ;;  %v17_v1 = vld [vmem:[%s321_s1 + $0x8] sm:$0xff]  ;;  %v18_v2 = vld [vmem:[%s321_s1 + $0x10] sm:$0xff]  ;;  %178 = vmatprep.subr.bf16.mxu0 %v230_v3  ;;  %175 = vmatprep.mubr.msk.f32.mxu0 %vm231_vm0, %v232_v6 }
   0x2   :  { %v179_v4 = vpack.c.bf16 %v17_v1, %v16_v0  ;;  %v19_v5 = vld [vmem:[%s321_s1 + $0x18] sm:$0xff]  ;;  %v20_v8 = vld [vmem:[%s321_s1 + $0x20] sm:$0xff]  ;;  %v21_v9 = vld [vmem:[%s321_s1 + $0x28] sm:$0xff] }
   0x3   :  { %v182_v7 = vpack.c.bf16 %v19_v5, %v18_v2 }
   0x4   :  { %180 = vmatpush3.bf16.msra.mxu0 %v179_v4 }
   0x5   :  { %181 = vmatprep.subr.bf16.mxu0 %v230_v3 }
   0x6   :  { %8 = vsyncpa [#allocation3], 0  ;;  %v185_v10 = vpack.c.bf16 %v21_v9, %v20_v8  ;;  %v22_v11 = vld [vmem:[%s321_s1 + $0x30] sm:$0xff]  ;;  %v23_v12 = vld [vmem:[%s321_s1 + $0x38] sm:$0xff]  ;;  %s233_s21 = smov [#allocation2]  }
   0x7   :  { %v188_v13 = vpack.c.bf16 %v23_v12, %v22_v11  ;;  %v24_v14 = vld [vmem:[%s321_s1 + $0x40] sm:$0xff]  ;;  %v25_v15 = vld [vmem:[%s321_s1 + $0x48] sm:$0xff]  ;;  %v26_v17 = vld [vmem:[%s321_s1 + $0x50] sm:$0xff]  ;;  %s117_s22 = sshll.u32 %s233_s21, 4  ;;  %s118_s22 = int_to_ptr.vmem [resolvable:$true] %s117_s22 }
   0x8   :  { %183 = vmatpush3.bf16.msra.mxu0 %v182_v7  ;;  %v191_v16 = vpack.c.bf16 %v25_v15, %v24_v14  ;;  %v27_v18 = vld [vmem:[%s321_s1 + $0x58] sm:$0xff]  ;;  %v28_v20 = vld [vmem:[%s321_s1 + $0x60] sm:$0xff]  ;;  %v29_v21 = vld [vmem:[%s321_s1 + $0x68] sm:$0xff]  ;;  %p211_p1 = scmp.lt.s32.totalorder %s118_s22, %s118_s22 }
   0x9   :  { %184 = vmatprep.subr.bf16.mxu0 %v230_v3  ;;  %v194_v19 = vpack.c.bf16 %v27_v18, %v26_v17  ;;  %v197_v22 = vpack.c.bf16 %v29_v21, %v28_v20  ;;  %v30_v23 = vld [vmem:[%s321_s1 + $0x70] sm:$0xff]  ;;  %v31_v24 = vld [vmem:[%s321_s1 + $0x78] sm:$0xff]  ;;  %v15_v26 = vld [vmem:[%s320_s0] sm:$0xff]  ;;  %s206_s1 = scalar_lea.vmem %s118_s22, 128 }
   0xa   :  { %v200_v25 = vpack.c.bf16 %v31_v24, %v30_v23  ;;  %v125_v27 = vld [vmem:[%s322_s2] ss:$0 sm:$0xff]  ;;  %p207_p0 = scmp.ne.s32.totalorder %s118_s22, %s206_s1  ;;  %p212_p2 = scmp.lt.s32.totalorder %s206_s1, %s206_s1 }
   0xc   :  { %186 = vmatpush3.bf16.msra.mxu0 %v185_v10  ;;  %p213_p3 = por %p212_p2, %p211_p1 }
   0xd   :  { %187 = vmatprep.subr.bf16.mxu0 %v230_v3 }
   0xe   :  { %p214_p4 = pnand %p213_p3, %p207_p0 }
  0x10   :  { %189 = vmatpush3.bf16.msra.mxu0 %v188_v13 }
  0x11   :  { %190 = vmatprep.subr.bf16.mxu0 %v230_v3 }
  0x14   :  { %192 = vmatpush3.bf16.msra.mxu0 %v191_v16 }
  0x15   :  { %193 = vmatprep.subr.bf16.mxu0 %v230_v3 }
  0x18   :  { %195 = vmatpush3.bf16.msra.mxu0 %v194_v19 }
  0x19   :  { %196 = vmatprep.subr.bf16.mxu0 %v230_v3 }
  0x1c   :  { %198 = vmatpush3.bf16.msra.mxu0 %v197_v22 }
  0x1d   :  { %199 = vmatprep.subr.bf16.mxu0 %v230_v3 }
  0x20   :  { %201 = vmatpush3.bf16.msra.mxu0 %v200_v25 }
  0x23   :  { %176 = vmatmul.mubr.f32.vlgmr.msra.gmra.mrb[0].mxu0 %v15_v26 }
  0xf6   :  { %v105_v28 = vpop.f32.mrb[0].mxu0 }
  0xf7   :  { %v106_v29 = vadd.f32 %v125_v27, %v105_v28  ;;  %v177_v30 = vpop.f32.mrb[1].mxu0 }
  0xf9   :  { %v109_v31 = vmax.f32 %v106_v29, 0.0 }
  0xfb   :  { %110 = vst [vmem:[#allocation2] sm:$0xff] %v109_v31 }
  0xfc   :  { %217 = shalt.err (!%p214_p4)
}
  0xfd   :  { %s218_s24 = scalar_lea.hbm %s323_s3, 128 }
  0xfe   :  { %p219_p5 = scmp.ne.s32.totalorder %s323_s3, %s218_s24  ;;  %p222_p6 = scmp.lt.u32.totalorder %s218_s24, %s323_s3 }
 0x100   :  { %p224_p7 = pnand %p222_p6, %p219_p5 }
 0x102   :  { %227 = shalt.err (!%p224_p7)
}
 0x103   :  { %120 = dma.vmem_to_hbm [thread:$0]  %s118_s22, 128, %s323_s3, [#allocation3]  }
 0x104   :  { %228 = dma.done.wait [#allocation3], 128  }
 0x105   :  { %229 = vsyncadd [#allocation3], 4294967168 }
 0x106   :  { %124 = vsyncpa [#allocation3], 1 }

</bundles_post_ra>
